<compile_context>
chip_gen: v5e
topology: v5e:2x2
jax: 0.10.0
libtpu: 0.0.40
codegen_flags: <defaults>
</compile_context>

<pallas_src>
import jax
import jax.numpy as jnp
from jax.experimental import pallas as pl
from jax.experimental.pallas import tpu as pltpu

EPS = 1e-5
NUM_REPEATS = 4  # the module applies the same BatchNorm 4 times


def _round_up(a, b):
    return (a + b - 1) // b * b


def _bn_affine_kernel(x_ref, s_ref, t_ref, o_ref):
    # x_ref: (rows_tile, lane_tile); s_ref / t_ref: (rows_tile, 1) per-row affine.
    # Single fused multiply-add per element (the 4 BNs are pre-composed).
    o_ref[...] = x_ref[...] * s_ref[...] + t_ref[...]


def batchnorm2d_inference_x4(x, weight, bias, running_mean, running_var):
    """x: (N, C, H, W) float32; params: (C,) float32. Returns (N, C, H, W)."""
    N, C, H, W = x.shape
    NC, HW = N * C, H * W

    # Compose the 4 identical inference BNs into one per-channel affine.
    # Done on the tiny (C,) parameter vectors -> negligible cost.
    scale = weight * jax.lax.rsqrt(running_var + EPS)
    shift = bias - running_mean * scale
    scale4 = scale ** 4
    shift4 = shift * (1.0 + scale + scale * scale + scale * scale * scale)

    # Row-major (N*C, H*W) view: row r corresponds to (batch r//C, channel r%C).
    x2 = x.reshape(NC, HW)
    row_scale = jnp.tile(scale4, N).reshape(NC, 1)
    row_shift = jnp.tile(shift4, N).reshape(NC, 1)

    # Tile sizes: full sublanes (multiple of 8 rows), lane-dense (multiple of
    # 128 lanes), ~2 MB per x tile => in+out double-buffered ~8 MB, safe on all
    # generations (incl. v7x's 64 MiB VMEM / 32 MiB default scoped limit).
    rows_tile = min(_round_up(NC, 8), 256)
    lane_tile = min(_round_up(HW, 128), 2048)
    NC_pad = _round_up(NC, rows_tile)
    HW_pad = _round_up(HW, lane_tile)

    if (NC_pad, HW_pad) != (NC, HW):
        x2 = jnp.pad(x2, ((0, NC_pad - NC), (0, HW_pad - HW)))
        row_scale = jnp.pad(row_scale, ((0, NC_pad - NC), (0, 0)))
        row_shift = jnp.pad(row_shift, ((0, NC_pad - NC), (0, 0)))

    grid = (NC_pad // rows_tile, HW_pad // lane_tile)

    out2 = pl.pallas_call(
        _bn_affine_kernel,
        out_shape=jax.ShapeDtypeStruct((NC_pad, HW_pad), x.dtype),
        grid_spec=pl.GridSpec(
            grid=grid,
            in_specs=[
                pl.BlockSpec((rows_tile, lane_tile), lambda r, c: (r, c)),  # x slab
                pl.BlockSpec((rows_tile, 1), lambda r, c: (r, 0)),          # scale4 per row
                pl.BlockSpec((rows_tile, 1), lambda r, c: (r, 0)),          # shift4 per row
            ],
            out_specs=pl.BlockSpec((rows_tile, lane_tile), lambda r, c: (r, c)),
        ),
        compiler_params=pltpu.CompilerParams(
            dimension_semantics=("parallel", "parallel"),
        ),
    )(x2, row_scale, row_shift)

    return out2[:NC, :HW].reshape(N, C, H, W)


def _reference(x, weight, bias, running_mean, running_var):
    # Pure-JAX reference of the PyTorch forward (4 sequential inference BNs).
    scale = weight / jnp.sqrt(running_var + EPS)
    shift = bias - running_mean * scale
    y = x
    for _ in range(NUM_REPEATS):
        y = y * scale[None, :, None, None] + shift[None, :, None, None]
    return y


if __name__ == "__main__":
    key = jax.random.PRNGKey(0)
    kx, kw, kb, km, kv = jax.random.split(key, 5)

    N, C, H, W = 2, 3, 16, 16  # BatchNorm2d(3) => channels must be 3
    x = jax.random.normal(kx, (N, C, H, W), dtype=jnp.float32)

    # Deterministic synthetic parameters (nn.BatchNorm2d(3) param/buffer shapes: (3,)).
    weight = 1.0 + 0.1 * jax.random.normal(kw, (C,), dtype=jnp.float32)
    bias = 0.1 * jax.random.normal(kb, (C,), dtype=jnp.float32)
    running_mean = 0.2 * jax.random.normal(km, (C,), dtype=jnp.float32)
    running_var = 1.0 + 0.1 * jax.nn.softplus(jax.random.normal(kv, (C,), dtype=jnp.float32))

    out = batchnorm2d_inference_x4(x, weight, bias, running_mean, running_var)
    out = jax.block_until_ready(out)

    ref = _reference(x, weight, bias, running_mean, running_var)
    assert out.shape == (N, C, H, W)
    assert jnp.allclose(out, ref, atol=1e-5, rtol=1e-5), "mismatch vs reference"

    print("KERNEL_OK")
</pallas_src>

<mosaic_0001>
module attributes {stable_mosaic.version = 11 : i64} {
  func.func @_bn_affine_kernel(%arg0: i32, %arg1: i32, %arg2: memref<8x256xf32, #tpu.memory_space<vmem>>, %arg3: memref<8x1xf32, #tpu.memory_space<vmem>>, %arg4: memref<8x1xf32, #tpu.memory_space<vmem>>, %arg5: memref<8x256xf32, #tpu.memory_space<vmem>>) attributes {dimension_semantics = [#tpu.dimension_semantics<parallel>, #tpu.dimension_semantics<parallel>], iteration_bounds = array<i64: 1, 1>, scalar_prefetch = 0 : i64, scratch_operands = 0 : i64, tpu.core_type = #tpu.core_type<tc>, window_params = [{transform_indices = @transform_0, window_bounds = array<i64: 8, 256>}, {transform_indices = @transform_1, window_bounds = array<i64: 8, 1>}, {transform_indices = @transform_2, window_bounds = array<i64: 8, 1>}, {transform_indices = @transform_3, window_bounds = array<i64: 8, 256>}]} {
    %c0 = arith.constant 0 : index
    %c0_0 = arith.constant 0 : index
    %0 = vector.load %arg2[%c0, %c0_0] : memref<8x256xf32, #tpu.memory_space<vmem>>, vector<8x256xf32>
    %c0_1 = arith.constant 0 : index
    %c0_2 = arith.constant 0 : index
    %1 = vector.load %arg3[%c0_1, %c0_2] : memref<8x1xf32, #tpu.memory_space<vmem>>, vector<8x1xf32>
    %2 = vector.broadcast %1 : vector<8x1xf32> to vector<8x256xf32>
    %3 = arith.mulf %0, %2 : vector<8x256xf32>
    %c0_3 = arith.constant 0 : index
    %c0_4 = arith.constant 0 : index
    %4 = vector.load %arg4[%c0_3, %c0_4] : memref<8x1xf32, #tpu.memory_space<vmem>>, vector<8x1xf32>
    %5 = vector.broadcast %4 : vector<8x1xf32> to vector<8x256xf32>
    %6 = arith.addf %3, %5 : vector<8x256xf32>
    %c0_5 = arith.constant 0 : index
    %c0_6 = arith.constant 0 : index
    %7 = vector.load %arg5[%c0_5, %c0_6] : memref<8x256xf32, #tpu.memory_space<vmem>>, vector<8x256xf32>
    tpu.vector_store %arg5[%c0_5, %c0_6], %6 {strides = array<i32>} : memref<8x256xf32, #tpu.memory_space<vmem>>, vector<8x256xf32>,
    return
  }
  func.func @transform_0(%arg0: i32, %arg1: i32) -> (i32, i32) {
    %c0_i32 = arith.constant 0 : i32
    return %arg0, %arg1 : i32, i32
  }
  func.func @transform_1(%arg0: i32, %arg1: i32) -> (i32, i32) {
    %c0_i32 = arith.constant 0 : i32
    %c0_i32_0 = arith.constant 0 : i32
    return %arg0, %c0_i32 : i32, i32
  }
  func.func @transform_2(%arg0: i32, %arg1: i32) -> (i32, i32) {
    %c0_i32 = arith.constant 0 : i32
    %c0_i32_0 = arith.constant 0 : i32
    return %arg0, %c0_i32 : i32, i32
  }
  func.func @transform_3(%arg0: i32, %arg1: i32) -> (i32, i32) {
    %c0_i32 = arith.constant 0 : i32
    return %arg0, %arg1 : i32, i32
  }
}

</mosaic_0001>

<bundles_post_ra>
// kernel: tpu_custom_call.1
= control target key start
LH: loop header
LB: loop body
LE: loop exit
PB: predicated region body
PF: predicated region fallthrough
CT: control target
= control target key end

     0   :  { %s117_s0 = inlined_call_operand.vmem [shape: f32[8,256], index: 0, kind: input, shape index: {}]   ;;  %s118_s1 = inlined_call_operand.vmem [shape: f32[8,1], index: 1, kind: input, shape index: {}]   ;;  %s119_s2 = inlined_call_operand.vmem [shape: f32[8,1], index: 2, kind: input, shape index: {}]   ;;  %s120_s3 = inlined_call_operand.hbm [shape: f32[8,256], index: 3, kind: output, shape index: {}]  }
   0x1   :  { %v17_v0 = vld [vmem:[%s118_s1] sm:$0xff] }
   0x2   :  { %8 = vsyncpa [#allocation3], 0  ;;  %v80_v1 = vmov 0   ;;  %v25_v2 = vld [vmem:[%s119_s2] sm:$0xff]  ;;  %v16_v5 = vld [vmem:[%s117_s0 + $0x8] sm:$0xff]  ;;  %s81_s1 = smov [#allocation2]  }
   0x3   :  { %53 = vset.pattern.permute.xlu0 %v80_v1  ;;  %v15_v4 = vld [vmem:[%s117_s0] sm:$0xff]  ;;  %s40_s20 = sshll.u32 %s81_s1, 4  ;;  %s42_s23 = sshll.u32 %s120_s3, 4  ;;  %s41_s20 = int_to_ptr.vmem [resolvable:$true] %s40_s20  ;;  %s43_s23 = int_to_ptr.hbm [resolvable:$true] %s42_s23 }
   0x4   :  { %20 = vperm.xlu0 %53, %v17_v0  }
   0xc   :  { %28 = vperm.xlu0 %53, %v25_v2  }
  0x76   :  { %v21_v3 = vpop.permute.xlu0 %20 }
  0x77   :  { %v23_v6 = vmul.f32 %v21_v3, %v15_v4  ;;  %v24_v7 = vmul.f32 %v21_v3, %v16_v5 }
  0x7e   :  { %v29_v8 = vpop.permute.xlu0 %28 }
  0x7f   :  { %v31_v9 = vadd.f32 %v29_v8, %v23_v6  ;;  %v32_v10 = vadd.f32 %v29_v8, %v24_v7 }
  0x81   :  { %33 = vst [vmem:[#allocation2] sm:$0xff] %v31_v9 }
  0x82   :  { %34 = vst [vmem:[#allocation2 + $0x8] sm:$0xff] %v32_v10 }
  0x83   :  { %45 = dma.vmem_to_hbm [thread:$0]  %s41_s20, 256, %s43_s23, [#allocation3]  }
  0x84   :  { %78 = dma.done.wait [#allocation3], 256  }
  0x85   :  { %79 = vsyncadd [#allocation3], 4294967040 }
  0x86   :  { %50 = vsyncpa [#allocation3], 1 }

</bundles_post_ra>
